<compile_context>
chip_gen: v7x
topology: tpu7x:2x2x1
jax: 0.10.0
libtpu: 0.0.40
codegen_flags: <defaults>
</compile_context>

<pallas_src>
import functools
import math

import jax
import jax.numpy as jnp
from jax.experimental import pallas as pl
from jax.experimental.pallas import tpu as pltpu

_LANES = 128
_SUB = 8
_MAX_TILE_ROWS = 8192          # (8192, 128) f32 block = 4 MiB per pipeline buffer
_CHUNK_ROWS = 64               # 8 vregs per operand per inner-loop iteration
_VMEM_LIMIT_BYTES = 48 * 1024 * 1024


def _pick_chunk(tile_m):
    for c in (_CHUNK_ROWS, 32, 16, 8):
        if tile_m % c == 0:
            return c
    return 8  # unreachable: tile_m is always a multiple of 8


def _default_num_splits():
    try:
        kind = jax.devices()[0].device_kind.lower()
    except Exception:
        return 1
    return 2 if ("v7" in kind or "7x" in kind) else 1


def _dice_partial_kernel(x_ref, t_ref, o_pt_ref, o_den_ref, *,
                         steps, total_rows, chunk_rows):
    """Accumulates (8,128) partials of sum(p*t) and sum(p*p + t*t).

    Grid is (num_splits, steps): axis 0 ("parallel") = core split, axis 1
    ("arbitrary") = reduction steps.  Each split owns its own (1, 8, 128)
    output blocks, which stay resident across the reduction axis.
    """
    c = pl.program_id(0)
    i = pl.program_id(1)
    tile_m = x_ref.shape[0]
    block_start = (c * steps + i) * tile_m          # in rows

    @pl.when(i == 0)
    def _init():
        o_pt_ref[...] = jnp.zeros_like(o_pt_ref)
        o_den_ref[...] = jnp.zeros_like(o_den_ref)

    n_chunks = tile_m // chunk_rows
    folds = chunk_rows // _SUB

    def accumulate(masked):
        if masked:
            row = jax.lax.broadcasted_iota(jnp.int32, (chunk_rows, _LANES), 0)

        def body(j, carry):
            acc_pt, acc_den = carry
            r0 = pl.multiple_of(j * chunk_rows, chunk_rows)
            p = x_ref[pl.ds(r0, chunk_rows), :].astype(jnp.float32)
            t = t_ref[pl.ds(r0, chunk_rows), :].astype(jnp.float32)
            if masked:
                # Select-style masking: garbage in the DMA'd tail / duplicate
                # clamped block never reaches the arithmetic.
                valid = (block_start + r0 + row) < total_rows
                p = jnp.where(valid, p, 0.0)
                t = jnp.where(valid, t, 0.0)
            # Leading-axis fold (layout-free reshape, pure VALU adds).
            pt = (p * t).reshape(folds, _SUB, _LANES).sum(axis=0)
            den = (p * p + t * t).reshape(folds, _SUB, _LANES).sum(axis=0)
            return acc_pt + pt, acc_den + den

        zero = jnp.zeros((_SUB, _LANES), jnp.float32)
        acc_pt, acc_den = jax.lax.fori_loop(0, n_chunks, body, (zero, zero))
        # One tiny RMW of the resident output block per grid step.
        o_pt_ref[...] += acc_pt[None]
        o_den_ref[...] += acc_den[None]

    is_interior = block_start + tile_m <= total_rows

    @pl.when(is_interior)
    def _fast():
        accumulate(masked=False)

    @pl.when(jnp.logical_not(is_interior))
    def _tail():
        accumulate(masked=True)


@functools.partial(jax.jit, static_argnames=("max_tile_rows", "num_splits"))
def dice_coefficient(prediction, target, eps=1e-6, *,
                     max_tile_rows=_MAX_TILE_ROWS, num_splits=None):
    """Dice coefficient: 2 * sum(p*t) / max(sum(p*p) + sum(t*t), eps)."""
    assert prediction.shape == target.shape, "prediction/target shape mismatch"
    if num_splits is None:
        num_splits = _default_num_splits()

    n = math.prod(prediction.shape)
    x = prediction.reshape(-1)            # native dtype; cast happens in-kernel
    t = target.reshape(-1)

    # Pad element count up to a multiple of 8*128 so the flat array reshapes
    # (for free) into a lane-dense (rows, 128) view with rows % 8 == 0.
    # Padded zeros contribute 0 to every sum.
    # TODO(synk): zero-copy ragged tail (1-D blocks or manual DMA) to avoid the
    # full-array pad copy when n % 1024 != 0.
    pad = (-n) % (_SUB * _LANES)
    if pad:
        x = jnp.pad(x, (0, pad))
        t = jnp.pad(t, (0, pad))

    rows = (n + pad) // _LANES
    x2 = x.reshape(rows, _LANES)
    t2 = t.reshape(rows, _LANES)

    tile_m = rows if rows <= max_tile_rows else max_tile_rows
    n_blocks = pl.cdiv(rows, tile_m)
    steps = pl.cdiv(n_blocks, num_splits)
    chunk_rows = _pick_chunk(tile_m)

    def in_index_map(c, i):
        # Clamp logical block index; out-of-range blocks are fully masked
        # inside the kernel, so reading a duplicate block is harmless.
        return (jnp.minimum(c * steps + i, n_blocks - 1), 0)

    kernel = functools.partial(_dice_partial_kernel, steps=steps,
                               total_rows=rows, chunk_rows=chunk_rows)

    out_pt, out_den = pl.pallas_call(
        kernel,
        out_shape=(jax.ShapeDtypeStruct((num_splits, _SUB, _LANES), jnp.float32),
                   jax.ShapeDtypeStruct((num_splits, _SUB, _LANES), jnp.float32)),
        grid_spec=pltpu.PrefetchScalarGridSpec(
            num_scalar_prefetch=0,
            grid=(num_splits, steps),
            in_specs=[
                pl.BlockSpec((tile_m, _LANES), in_index_map),
                pl.BlockSpec((tile_m, _LANES), in_index_map),
            ],
            out_specs=[
                pl.BlockSpec((1, _SUB, _LANES), lambda c, i: (c, 0, 0)),
                pl.BlockSpec((1, _SUB, _LANES), lambda c, i: (c, 0, 0)),
            ],
        ),
        compiler_params=pltpu.CompilerParams(
            dimension_semantics=("parallel", "arbitrary"),
            vmem_limit_bytes=_VMEM_LIMIT_BYTES,
        ),
    )(x2, t2)

    s_pt = jnp.sum(out_pt)                # tiny host-graph reduction
    s_den = jnp.sum(out_den)
    return 2.0 * s_pt / jnp.maximum(s_den, eps)   # == denominator.clamp(min=eps)


def _reference_dice(prediction, target, eps=1e-6):
    """Pure-JAX reference of the PyTorch forward."""
    p = prediction.astype(jnp.float32)
    t = target.astype(jnp.float32)
    intersection = jnp.sum(p * t)
    denominator = jnp.sum(p * p) + jnp.sum(t * t)
    return 2.0 * intersection / jnp.maximum(denominator, eps)


if __name__ == "__main__":
    key = jax.random.PRNGKey(0)
    k1, k2, k3, k4 = jax.random.split(key, 4)

    # 3D-segmentation style shapes (B, C, D, H, W).
    B, C, D, H, W = 2, 4, 8, 16, 16
    pred = jax.random.uniform(k1, (B, C, D, H, W), jnp.float32)
    targ = (jax.random.uniform(k2, (B, C, D, H, W), jnp.float32) > 0.5)
    targ = targ.astype(jnp.float32)

    out = jax.block_until_ready(dice_coefficient(pred, targ))
    ref = _reference_dice(pred, targ)
    assert jnp.allclose(out, ref, rtol=1e-5, atol=1e-6), (out, ref)

    # Element count not a multiple of 1024 -> exercises the padded-tail path.
    shape2 = (1, 3, 5, 7, 9)
    p2 = jax.random.uniform(k3, shape2, jnp.float32)
    t2 = jax.random.uniform(k4, shape2, jnp.float32)
    out2 = jax.block_until_ready(dice_coefficient(p2, t2))
    ref2 = _reference_dice(p2, t2)
    assert jnp.allclose(out2, ref2, rtol=1e-5, atol=1e-6), (out2, ref2)

    # Multiple reduction steps + a partial (masked) tail block.
    shape3 = (2, 4, 8, 24, 24)            # 36864 elems -> 288 rows, tile=64
    p3 = jax.random.uniform(k3, shape3, jnp.float32)
    t3 = (jax.random.uniform(k4, shape3, jnp.float32) > 0.5).astype(jnp.float32)
    out3 = jax.block_until_ready(dice_coefficient(p3, t3, max_tile_rows=64))
    ref3 = _reference_dice(p3, t3)
    assert jnp.allclose(out3, ref3, rtol=1e-5, atol=1e-6), (out3, ref3)

    # Forced 2-way split: exercises the clamped duplicate-block masking path
    # (odd n_blocks) regardless of which TPU generation this runs on.
    out4 = jax.block_until_ready(
        dice_coefficient(p3, t3, max_tile_rows=64, num_splits=2))
    assert jnp.allclose(out4, ref3, rtol=1e-5, atol=1e-6), (out4, ref3)

    print("KERNEL_OK")
</pallas_src>

<mosaic_0001>
module attributes {stable_mosaic.version = 11 : i64} {
  func.func @_dice_partial_kernel(%arg0: i32, %arg1: i32, %arg2: memref<128x128xf32, #tpu.memory_space<vmem>>, %arg3: memref<128x128xf32, #tpu.memory_space<vmem>>, %arg4: memref<1x8x128xf32, #tpu.memory_space<vmem>>, %arg5: memref<1x8x128xf32, #tpu.memory_space<vmem>>) attributes {dimension_semantics = [#tpu.dimension_semantics<parallel>, #tpu.dimension_semantics<arbitrary>], iteration_bounds = array<i64: 1, 1>, scalar_prefetch = 0 : i64, scratch_operands = 0 : i64, tpu.core_type = #tpu.core_type<tc>, window_params = [{transform_indices = @transform_0, window_bounds = array<i64: 128, 128>}, {transform_indices = @transform_1, window_bounds = array<i64: 128, 128>}, {transform_indices = @transform_2, window_bounds = array<i64: 1, 8, 128>}, {transform_indices = @transform_3, window_bounds = array<i64: 1, 8, 128>}]} {
    %c1_i32 = arith.constant 1 : i32
    %0 = arith.muli %arg0, %c1_i32 : i32
    %1 = arith.addi %0, %arg1 : i32
    %c128_i32 = arith.constant 128 : i32
    %2 = arith.muli %1, %c128_i32 : i32
    %c0_i32 = arith.constant 0 : i32
    %3 = arith.cmpi eq, %arg1, %c0_i32 : i32
    %4 = arith.extui %3 : i1 to i32
    %c0_i32_0 = arith.constant 0 : i32
    %5 = arith.cmpi ne, %4, %c0_i32_0 : i32
    scf.if %5 {
      %cst = arith.constant 0.000000e+00 : f32
      %13 = vector.broadcast %cst : f32 to vector<1x8x128xf32>
      %c0 = arith.constant 0 : index
      %c0_5 = arith.constant 0 : index
      %c0_6 = arith.constant 0 : index
      %14 = vector.load %arg4[%c0, %c0_5, %c0_6] : memref<1x8x128xf32, #tpu.memory_space<vmem>>, vector<1x8x128xf32>
      tpu.vector_store %arg4[%c0, %c0_5, %c0_6], %13 {strides = array<i32>} : memref<1x8x128xf32, #tpu.memory_space<vmem>>, vector<1x8x128xf32>,
      %cst_7 = arith.constant 0.000000e+00 : f32
      %15 = vector.broadcast %cst_7 : f32 to vector<1x8x128xf32>
      %c0_8 = arith.constant 0 : index
      %c0_9 = arith.constant 0 : index
      %c0_10 = arith.constant 0 : index
      %16 = vector.load %arg5[%c0_8, %c0_9, %c0_10] : memref<1x8x128xf32, #tpu.memory_space<vmem>>, vector<1x8x128xf32>
      tpu.vector_store %arg5[%c0_8, %c0_9, %c0_10], %15 {strides = array<i32>} : memref<1x8x128xf32, #tpu.memory_space<vmem>>, vector<1x8x128xf32>,
    } else {
    }
    %c128_i32_1 = arith.constant 128 : i32
    %6 = arith.addi %2, %c128_i32_1 : i32
    %c128_i32_2 = arith.constant 128 : i32
    %7 = arith.cmpi sle, %6, %c128_i32_2 : i32
    %8 = arith.extui %7 : i1 to i32
    %c0_i32_3 = arith.constant 0 : i32
    %9 = arith.cmpi ne, %8, %c0_i32_3 : i32
    scf.if %9 {
      %cst = arith.constant 0.000000e+00 : f32
      %13 = vector.broadcast %cst : f32 to vector<8x128xf32>
      %c0_i32_5 = arith.constant 0 : i32
      %c2_i32 = arith.constant 2 : i32
      %14 = arith.addi %c0_i32_5, %c2_i32 : i32
      %c1_i32_6 = arith.constant 1 : i32
      %15:2 = scf.for %arg6 = %c0_i32_5 to %14 step %c1_i32_6 iter_args(%arg7 = %13, %arg8 = %13) -> (vector<8x128xf32>, vector<8x128xf32>)  : i32 {
        %c64_i32 = arith.constant 64 : i32
        %24 = arith.muli %arg6, %c64_i32 : i32
        %25 = tpu.assume_multiple %24, 64 : i32
        %26 = arith.index_cast %25 : i32 to index
        %c0_19 = arith.constant 0 : index
        %27 = vector.load %arg2[%26, %c0_19] : memref<128x128xf32, #tpu.memory_space<vmem>>, vector<64x128xf32>
        %28 = arith.index_cast %25 : i32 to index
        %c0_20 = arith.constant 0 : index
        %29 = vector.load %arg3[%28, %c0_20] : memref<128x128xf32, #tpu.memory_space<vmem>>, vector<64x128xf32>
        %30 = arith.mulf %27, %29 : vector<64x128xf32>
        %31 = vector.shape_cast %30 : vector<64x128xf32> to vector<8x8x128xf32>
        %cst_21 = arith.constant dense<0.000000e+00> : vector<8x128xf32>
        %32 = vector.multi_reduction <add>, %31, %cst_21 [0] : vector<8x8x128xf32> to vector<8x128xf32>
        %33 = arith.mulf %27, %27 : vector<64x128xf32>
        %34 = arith.mulf %29, %29 : vector<64x128xf32>
        %35 = arith.addf %33, %34 : vector<64x128xf32>
        %36 = vector.shape_cast %35 : vector<64x128xf32> to vector<8x8x128xf32>
        %cst_22 = arith.constant dense<0.000000e+00> : vector<8x128xf32>
        %37 = vector.multi_reduction <add>, %36, %cst_22 [0] : vector<8x8x128xf32> to vector<8x128xf32>
        %38 = arith.addf %arg7, %32 : vector<8x128xf32>
        %39 = arith.addf %arg8, %37 : vector<8x128xf32>
        scf.yield %38, %39 : vector<8x128xf32>, vector<8x128xf32>
      }
      %c2_i32_7 = arith.constant 2 : i32
      %c0 = arith.constant 0 : index
      %c0_8 = arith.constant 0 : index
      %c0_9 = arith.constant 0 : index
      %16 = vector.load %arg4[%c0, %c0_8, %c0_9] : memref<1x8x128xf32, #tpu.memory_space<vmem>>, vector<1x8x128xf32>
      %17 = vector.shape_cast %15#0 : vector<8x128xf32> to vector<1x8x128xf32>
      %18 = arith.addf %16, %17 : vector<1x8x128xf32>
      %c0_10 = arith.constant 0 : index
      %c0_11 = arith.constant 0 : index
      %c0_12 = arith.constant 0 : index
      %19 = vector.load %arg4[%c0_10, %c0_11, %c0_12] : memref<1x8x128xf32, #tpu.memory_space<vmem>>, vector<1x8x128xf32>
      tpu.vector_store %arg4[%c0_10, %c0_11, %c0_12], %18 {strides = array<i32>} : memref<1x8x128xf32, #tpu.memory_space<vmem>>, vector<1x8x128xf32>,
      %c0_13 = arith.constant 0 : index
      %c0_14 = arith.constant 0 : index
      %c0_15 = arith.constant 0 : index
      %20 = vector.load %arg5[%c0_13, %c0_14, %c0_15] : memref<1x8x128xf32, #tpu.memory_space<vmem>>, vector<1x8x128xf32>
      %21 = vector.shape_cast %15#1 : vector<8x128xf32> to vector<1x8x128xf32>
      %22 = arith.addf %20, %21 : vector<1x8x128xf32>
      %c0_16 = arith.constant 0 : index
      %c0_17 = arith.constant 0 : index
      %c0_18 = arith.constant 0 : index
      %23 = vector.load %arg5[%c0_16, %c0_17, %c0_18] : memref<1x8x128xf32, #tpu.memory_space<vmem>>, vector<1x8x128xf32>
      tpu.vector_store %arg5[%c0_16, %c0_17, %c0_18], %22 {strides = array<i32>} : memref<1x8x128xf32, #tpu.memory_space<vmem>>, vector<1x8x128xf32>,
    } else {
    }
    %true = arith.constant true
    %10 = arith.xori %7, %true : i1
    %11 = arith.extui %10 : i1 to i32
    %c0_i32_4 = arith.constant 0 : i32
    %12 = arith.cmpi ne, %11, %c0_i32_4 : i32
    scf.if %12 {
      %13 = tpu.iota {dimensions = array<i32: 0>} : vector<64x128xi32>
      %cst = arith.constant 0.000000e+00 : f32
      %14 = vector.broadcast %cst : f32 to vector<8x128xf32>
      %c0_i32_5 = arith.constant 0 : i32
      %c2_i32 = arith.constant 2 : i32
      %15 = arith.addi %c0_i32_5, %c2_i32 : i32
      %c1_i32_6 = arith.constant 1 : i32
      %16:2 = scf.for %arg6 = %c0_i32_5 to %15 step %c1_i32_6 iter_args(%arg7 = %14, %arg8 = %14) -> (vector<8x128xf32>, vector<8x128xf32>)  : i32 {
        %c64_i32 = arith.constant 64 : i32
        %25 = arith.muli %arg6, %c64_i32 : i32
        %26 = tpu.assume_multiple %25, 64 : i32
        %27 = arith.index_cast %26 : i32 to index
        %c0_19 = arith.constant 0 : index
        %28 = vector.load %arg2[%27, %c0_19] : memref<128x128xf32, #tpu.memory_space<vmem>>, vector<64x128xf32>
        %29 = arith.index_cast %26 : i32 to index
        %c0_20 = arith.constant 0 : index
        %30 = vector.load %arg3[%29, %c0_20] : memref<128x128xf32, #tpu.memory_space<vmem>>, vector<64x128xf32>
        %31 = arith.addi %2, %26 : i32
        %32 = vector.broadcast %31 : i32 to vector<64x128xi32>
        %33 = arith.addi %32, %13 : vector<64x128xi32>
        %c128_i32_21 = arith.constant 128 : i32
        %34 = vector.broadcast %c128_i32_21 : i32 to vector<64x128xi32>
        %35 = arith.cmpi slt, %33, %34 : vector<64x128xi32>
        %cst_22 = arith.constant 0.000000e+00 : f32
        %36 = vector.broadcast %cst_22 : f32 to vector<64x128xf32>
        %37 = arith.select %35, %28, %36 : vector<64x128xi1>, vector<64x128xf32>
        %cst_23 = arith.constant 0.000000e+00 : f32
        %38 = vector.broadcast %cst_23 : f32 to vector<64x128xf32>
        %39 = arith.select %35, %30, %38 : vector<64x128xi1>, vector<64x128xf32>
        %40 = arith.mulf %37, %39 : vector<64x128xf32>
        %41 = vector.shape_cast %40 : vector<64x128xf32> to vector<8x8x128xf32>
        %cst_24 = arith.constant dense<0.000000e+00> : vector<8x128xf32>
        %42 = vector.multi_reduction <add>, %41, %cst_24 [0] : vector<8x8x128xf32> to vector<8x128xf32>
        %43 = arith.mulf %37, %37 : vector<64x128xf32>
        %44 = arith.mulf %39, %39 : vector<64x128xf32>
        %45 = arith.addf %43, %44 : vector<64x128xf32>
        %46 = vector.shape_cast %45 : vector<64x128xf32> to vector<8x8x128xf32>
        %cst_25 = arith.constant dense<0.000000e+00> : vector<8x128xf32>
        %47 = vector.multi_reduction <add>, %46, %cst_25 [0] : vector<8x8x128xf32> to vector<8x128xf32>
        %48 = arith.addf %arg7, %42 : vector<8x128xf32>
        %49 = arith.addf %arg8, %47 : vector<8x128xf32>
        scf.yield %48, %49 : vector<8x128xf32>, vector<8x128xf32>
      }
      %c2_i32_7 = arith.constant 2 : i32
      %c0 = arith.constant 0 : index
      %c0_8 = arith.constant 0 : index
      %c0_9 = arith.constant 0 : index
      %17 = vector.load %arg4[%c0, %c0_8, %c0_9] : memref<1x8x128xf32, #tpu.memory_space<vmem>>, vector<1x8x128xf32>
      %18 = vector.shape_cast %16#0 : vector<8x128xf32> to vector<1x8x128xf32>
      %19 = arith.addf %17, %18 : vector<1x8x128xf32>
      %c0_10 = arith.constant 0 : index
      %c0_11 = arith.constant 0 : index
      %c0_12 = arith.constant 0 : index
      %20 = vector.load %arg4[%c0_10, %c0_11, %c0_12] : memref<1x8x128xf32, #tpu.memory_space<vmem>>, vector<1x8x128xf32>
      tpu.vector_store %arg4[%c0_10, %c0_11, %c0_12], %19 {strides = array<i32>} : memref<1x8x128xf32, #tpu.memory_space<vmem>>, vector<1x8x128xf32>,
      %c0_13 = arith.constant 0 : index
      %c0_14 = arith.constant 0 : index
      %c0_15 = arith.constant 0 : index
      %21 = vector.load %arg5[%c0_13, %c0_14, %c0_15] : memref<1x8x128xf32, #tpu.memory_space<vmem>>, vector<1x8x128xf32>
      %22 = vector.shape_cast %16#1 : vector<8x128xf32> to vector<1x8x128xf32>
      %23 = arith.addf %21, %22 : vector<1x8x128xf32>
      %c0_16 = arith.constant 0 : index
      %c0_17 = arith.constant 0 : index
      %c0_18 = arith.constant 0 : index
      %24 = vector.load %arg5[%c0_16, %c0_17, %c0_18] : memref<1x8x128xf32, #tpu.memory_space<vmem>>, vector<1x8x128xf32>
      tpu.vector_store %arg5[%c0_16, %c0_17, %c0_18], %23 {strides = array<i32>} : memref<1x8x128xf32, #tpu.memory_space<vmem>>, vector<1x8x128xf32>,
    } else {
    }
    return
  }
  func.func @transform_0(%arg0: i32, %arg1: i32) -> (i32, i32) {
    %c1_i32 = arith.constant 1 : i32
    %0 = arith.muli %arg0, %c1_i32 : i32
    %1 = arith.addi %0, %arg1 : i32
    %c0_i32 = arith.constant 0 : i32
    %2 = arith.minsi %1, %c0_i32 : i32
    %c0_i32_0 = arith.constant 0 : i32
    %c0_i32_1 = arith.constant 0 : i32
    return %2, %c0_i32_0 : i32, i32
  }
  func.func @transform_1(%arg0: i32, %arg1: i32) -> (i32, i32) {
    %c1_i32 = arith.constant 1 : i32
    %0 = arith.muli %arg0, %c1_i32 : i32
    %1 = arith.addi %0, %arg1 : i32
    %c0_i32 = arith.constant 0 : i32
    %2 = arith.minsi %1, %c0_i32 : i32
    %c0_i32_0 = arith.constant 0 : i32
    %c0_i32_1 = arith.constant 0 : i32
    return %2, %c0_i32_0 : i32, i32
  }
  func.func @transform_2(%arg0: i32, %arg1: i32) -> (i32, i32, i32) {
    %c0_i32 = arith.constant 0 : i32
    %c0_i32_0 = arith.constant 0 : i32
    %c0_i32_1 = arith.constant 0 : i32
    return %arg0, %c0_i32, %c0_i32_0 : i32, i32, i32
  }
  func.func @transform_3(%arg0: i32, %arg1: i32) -> (i32, i32, i32) {
    %c0_i32 = arith.constant 0 : i32
    %c0_i32_0 = arith.constant 0 : i32
    %c0_i32_1 = arith.constant 0 : i32
    return %arg0, %c0_i32, %c0_i32_0 : i32, i32, i32
  }
}

</mosaic_0001>

<bundles_post_ra>
// kernel: dice_coefficient.1
= control target key start
LH: loop header
LB: loop body
LE: loop exit
PB: predicated region body
PF: predicated region fallthrough
CT: control target
= control target key end

     0   :  { %v400_v0 = vmov 0.0   ;;  %v427_v1 = vmov 0.0   ;;  %v429_v2 = vmov 0.0   ;;  %s431_s16 = smov 0   ;;  %s490_s0 = inlined_call_operand.vmem [shape: f32[128,128], index: 0, kind: input, shape index: {}]   ;;  %s491_s1 = inlined_call_operand.vmem [shape: f32[128,128], index: 1, kind: input, shape index: {}]   ;;  %s492_s2 = inlined_call_operand.vmem [shape: f32[1,8,128], index: 2, kind: output, shape index: {0}]   ;;  %s493_s3 = inlined_call_operand.vmem [shape: f32[1,8,128], index: 3, kind: output, shape index: {1}]  }
   0x1   :  { %83 = vst [vmem:[%s492_s2] sm:$0xff] %v400_v0  ;;  %84 = vst [vmem:[%s493_s3] sm:$0xff] %v400_v0 }
   0x2 LB: > { %s349_s17 = sshll.u32 %s398_s16, 6  ;;  %s95_s16 = sadd.s32 1, %s398_s16   ;;  %s398_s16 = sphi %s431_s16, %s95_s16   ;;  %v394_v2 = vphi %v429_v2, %v495_v2   ;;  %v390_v1 = vphi %v427_v1, %v494_v1  }
   0x3   : > { %s446_s20 = scalar_lea.vmem %s490_s0, %s349_s17  ;;  %s451_s23 = scalar_lea.vmem %s491_s1, %s349_s17 }
   0x4   : > { %v100_v3 = vld [vmem:[%s446_s20] sm:$0xff]  ;;  %v101_v4 = vld [vmem:[%s446_s20 + $0x8] sm:$0xff]  ;;  %v102_v5 = vld [vmem:[%s446_s20 + $0x10] sm:$0xff]  ;;  %p92_p0 = scmp.ge.s32.totalorder %s95_s16, 2  }
   0x5   : > { %v103_v6 = vld [vmem:[%s446_s20 + $0x18] sm:$0xff]  ;;  %v109_v7 = vld [vmem:[%s451_s23] sm:$0xff]  ;;  %v110_v8 = vld [vmem:[%s451_s23 + $0x8] sm:$0xff]  ;;  %v132_v12 = vmul.f32 %v100_v3, %v100_v3  ;;  %v133_v13 = vmul.f32 %v101_v4, %v101_v4  ;;  %v134_v18 = vmul.f32 %v102_v5, %v102_v5 }
   0x6   : > { %v111_v9 = vld [vmem:[%s451_s23 + $0x10] sm:$0xff]  ;;  %v112_v10 = vld [vmem:[%s451_s23 + $0x18] sm:$0xff]  ;;  %v117_v11 = vmul.f32 %v109_v7, %v100_v3  ;;  %v140_v14 = vmul.f32 %v109_v7, %v109_v7  ;;  %v104_v15 = vld [vmem:[%s446_s20 + $0x20] sm:$0xff]  ;;  %v118_v16 = vmul.f32 %v110_v8, %v101_v4  ;;  %v141_v19 = vmul.f32 %v110_v8, %v110_v8 }
   0x7   : > { %v119_v17 = vmul.f32 %v111_v9, %v102_v5  ;;  %v113_v20 = vld [vmem:[%s451_s23 + $0x20] sm:$0xff]  ;;  %v142_v21 = vmul.f32 %v111_v9, %v111_v9  ;;  %v105_v22 = vld [vmem:[%s446_s20 + $0x28] sm:$0xff]  ;;  %v120_v23 = vmul.f32 %v112_v10, %v103_v6  ;;  %v135_v25 = vmul.f32 %v103_v6, %v103_v6  ;;  %v106_v31 = vld [vmem:[%s446_s20 + $0x30] sm:$0xff] }
   0x8   : > { %v125_v24 = vadd.f32 %v118_v16, %v117_v11  ;;  %v143_v26 = vmul.f32 %v112_v10, %v112_v10  ;;  %v114_v27 = vld [vmem:[%s451_s23 + $0x28] sm:$0xff]  ;;  %v121_v28 = vmul.f32 %v113_v20, %v104_v15  ;;  %v136_v29 = vmul.f32 %v104_v15, %v104_v15  ;;  %v115_v36 = vld [vmem:[%s451_s23 + $0x30] sm:$0xff]  ;;  %v107_v39 = vld [vmem:[%s446_s20 + $0x38] sm:$0xff] }
   0x9   : > { %v148_v30 = vadd.f32 %v140_v14, %v132_v12  ;;  %v144_v33 = vmul.f32 %v113_v20, %v113_v20  ;;  %v149_v34 = vadd.f32 %v141_v19, %v133_v13  ;;  %v150_v35 = vadd.f32 %v142_v21, %v134_v18  ;;  %v116_v44 = vld [vmem:[%s451_s23 + $0x38] sm:$0xff]  ;;  %v165_v5 = vld [vmem:[%s492_s2] sm:$0xff] (%p92_p0) }
   0xa   : > { %v126_v32 = vadd.f32 %v125_v24, %v119_v17  ;;  %v122_v37 = vmul.f32 %v114_v27, %v105_v22  ;;  %v137_v38 = vmul.f32 %v105_v22, %v105_v22  ;;  %v145_v41 = vmul.f32 %v114_v27, %v114_v27 }
   0xb   : > { %v151_v42 = vadd.f32 %v143_v26, %v135_v25  ;;  %v156_v43 = vadd.f32 %v149_v34, %v148_v30  ;;  %v123_v45 = vmul.f32 %v115_v36, %v106_v31  ;;  %v138_v46 = vmul.f32 %v106_v31, %v106_v31 }
   0xc   : > { %v127_v40 = vadd.f32 %v126_v32, %v120_v23  ;;  %v146_v48 = vmul.f32 %v115_v36, %v115_v36  ;;  %v152_v49 = vadd.f32 %v144_v33, %v136_v29  ;;  %v124_v51 = vmul.f32 %v116_v44, %v107_v39 }
   0xd   : > { %v157_v50 = vadd.f32 %v156_v43, %v150_v35  ;;  %v139_v52 = vmul.f32 %v107_v39, %v107_v39  ;;  %v147_v54 = vmul.f32 %v116_v44, %v116_v44  ;;  %v153_v55 = vadd.f32 %v145_v41, %v137_v38 }
   0xe   : > { %v128_v47 = vadd.f32 %v127_v40, %v121_v28  ;;  %v154_v58 = vadd.f32 %v146_v48, %v138_v46 }
   0xf   : > { %v158_v56 = vadd.f32 %v157_v50, %v151_v42  ;;  %v155_v61 = vadd.f32 %v147_v54, %v139_v52 }
  0x10   : > { %v129_v53 = vadd.f32 %v128_v47, %v122_v37 }
  0x11   : > { %v159_v59 = vadd.f32 %v158_v56, %v152_v49 }
  0x12   : > { %v130_v57 = vadd.f32 %v129_v53, %v123_v45 }
  0x13   : > { %v160_v62 = vadd.f32 %v159_v59, %v153_v55 }
  0x14   : > { %v131_v60 = vadd.f32 %v130_v57, %v124_v51 }
  0x15   : > { %v161_v63 = vadd.f32 %v160_v62, %v154_v58  ;;  %94 = sbr.rel (!%p92_p0) target bundleno = 2 (0x2), region = 72 }
  0x16   : > { %v163_v0 = vadd.f32 %v394_v2, %v131_v60  }
  0x17   : > { %v162_v3 = vadd.f32 %v161_v63, %v155_v61 }
  0x18   : > { %v495_v2 = vmov %v163_v0  ;;  %v166_v6 = vadd.f32 (%p92_p0), %v165_v5, %v163_v0 }
  0x19   : > { %v164_v4 = vadd.f32 %v390_v1, %v162_v3   ;;  %v168_v2 = vld [vmem:[%s493_s3] sm:$0xff] (%p92_p0) }
  0x1a   :  { %167 = vst [vmem:[%s492_s2] sm:$0xff] (%p92_p0), %v166_v6 }
  0x1b   : > { %v494_v1 = vmov %v164_v4  ;;  %v169_v7 = vadd.f32 (%p92_p0), %v168_v2, %v164_v4 }
  0x1d   :  { %170 = vst [vmem:[%s493_s3] sm:$0xff] %v169_v7 }

</bundles_post_ra>
